<compile_context>
chip_gen: v7x
topology: tpu7x:2x2x1
jax: 0.10.0
libtpu: 0.0.40
codegen_flags: <defaults>
</compile_context>

<pallas_src>
import functools

import jax
import jax.numpy as jnp
from jax import lax
from jax.experimental import pallas as pl
from jax.experimental.pallas import tpu as pltpu

_LANE = 128

# Deterministic buffers from the PyTorch module's __init__ (kept for parity).
MATRIX_XYZ_TO_RGB = jnp.array(
    [[3.2404542, -1.5371385, -0.4985314],
     [-0.969266, 1.8760108, 0.041556],
     [0.0556434, -0.2040259, 1.0572252]], dtype=jnp.float32)
MATRIX_LAB_TO_XYZ = jnp.array(          # registered in __init__, unused in forward
    [[0.4124564, 0.3575761, 0.1804375],
     [0.2126729, 0.7151522, 0.072175],
     [0.0193339, 0.119192, 0.9503041]], dtype=jnp.float32)

_REF = (95.047, 100.0, 108.883)
_M = ((3.2404542, -1.5371385, -0.4985314),
      (-0.969266, 1.8760108, 0.041556),
      (0.0556434, -0.2040259, 1.0572252))
# XYZ->RGB matrix with the ref_X/ref_Y/ref_Z / 100 scales folded into its
# columns:  RGB = (M @ diag(ref/100)) @ finv(XYZ0).
_ME = tuple(tuple(_M[i][j] * (_REF[j] / 100.0) for j in range(3)) for i in range(3))


# ---------------------------------------------------------------------------
# Kernel bodies (shape-polymorphic over the (tile_rows, tile_cols) tile).
# ---------------------------------------------------------------------------
def _lab_tile_to_rgb(L, a, b):
    # Constant-folded scalar chains; reciprocal multiplies only (no divides):
    #   Y0 = ((L+1)*50 + 16)/116           == L*(50/116) + 66/116
    #   clip(a*127,-128,127)/500           == clip(a*(127/500), -128/500, 127/500)
    #   clip(b*127,-128,127)/200           == clip(b*(127/200), -128/200, 127/200)
    Y0 = L * (50.0 / 116.0) + (66.0 / 116.0)
    a_t = jnp.clip(a * (127.0 / 500.0), -128.0 / 500.0, 127.0 / 500.0)
    b_t = jnp.clip(b * (127.0 / 200.0), -128.0 / 200.0, 127.0 / 200.0)
    X0 = Y0 + a_t
    Z0 = Y0 - b_t

    eps = 0.008856

    def finv(t):
        t3 = t * t * t
        return jnp.where(t3 > eps, t3, (t - 16.0 / 116.0) * (1.0 / 7.787))

    fX, fY, fZ = finv(X0), finv(Y0), finv(Z0)

    # 3x3 per-pixel mix on the VPU; ref_* scales already folded into _ME.
    R = _ME[0][0] * fX + _ME[0][1] * fY + _ME[0][2] * fZ
    G = _ME[1][0] * fX + _ME[1][1] * fY + _ME[1][2] * fZ
    B = _ME[2][0] * fX + _ME[2][1] * fY + _ME[2][2] * fZ
    return (jnp.clip(R, 0.0, 1.0), jnp.clip(G, 0.0, 1.0), jnp.clip(B, 0.0, 1.0))


def _rgb_kernel(l_ref, ab_ref, o_ref):
    # Fast path (no finite-check): nothing but the colour transform.
    # l_ref: (1,1,T,C)  ab_ref: (1,2,T,C)  o_ref: (1,3,T,C)
    R, G, B = _lab_tile_to_rgb(l_ref[0, 0], ab_ref[0, 0], ab_ref[0, 1])
    o_ref[0, 0] = R
    o_ref[0, 1] = G
    o_ref[0, 2] = B


def _rgb_flag_kernel(l_ref, ab_ref, o_ref, flag_ref, *, total_rows, tile_rows):
    R, G, B = _lab_tile_to_rgb(l_ref[0, 0], ab_ref[0, 0], ab_ref[0, 1])
    o_ref[0, 0] = R
    o_ref[0, 1] = G
    o_ref[0, 2] = B
    # jnp.clip / torch.clamp remove Inf and propagate NaN, so a NaN check on
    # the already-clipped values is exactly the module's isnan|isinf check
    # (and keeps live ranges short).
    bad = (jnp.isnan(R) | jnp.isnan(G) | jnp.isnan(B)).astype(jnp.float32)
    if total_rows % tile_rows != 0:
        # Ragged last row-tile: out-of-bounds rows of the input block hold
        # garbage (their outputs are dropped by the masked writeback); keep
        # them out of the NaN flag.
        valid = total_rows - pl.program_id(1) * tile_rows
        row_ids = lax.broadcasted_iota(jnp.int32, bad.shape, 0)
        bad = jnp.where(row_ids < valid, bad, 0.0)
    m = jnp.max(bad, axis=1, keepdims=True)   # lane reduce    -> (T, 1)
    m = jnp.max(m, axis=0, keepdims=True)     # sublane reduce -> (1, 1)
    # TODO(synk): could shrink to an SMEM int32 scalar per tile; kept as a
    # dense (8,128) VMEM tile (known-good store path, off the hot path anyway).
    flag_ref[0, 0] = jnp.broadcast_to(m, (8, _LANE))


# ---------------------------------------------------------------------------
# Wrapper / tiling logic.
# ---------------------------------------------------------------------------
@functools.lru_cache(maxsize=1)
def _tpu_tuning():
    """Returns (row-tile cap for a 128-lane tile, assumed TensorCores/chip)."""
    kind = ""
    try:
        dev = jax.devices()[0]
        if dev.platform == "tpu":
            kind = dev.device_kind.lower()
    except Exception:
        pass
    if any(t in kind for t in ("tpu7", "v7", "7x")):
        return 4096, 2          # v7x: 3.2 TB/s HBM -> amortize step overhead; 2 TCs
    if any(t in kind for t in ("v6", "trillium")):
        return 4096, 1          # v6e: free ~3% from bigger steps
    return 2048, 1              # v5e & default: safe VMEM footprint


def _lab_to_rgb2_impl(L, AB, *, with_flag, ts_cap=None, num_tc=None):
    if L.ndim != 4 or AB.ndim != 4 or L.shape[1] != 1 or AB.shape[1] != 2:
        raise ValueError("expected L:(N,1,H,W) and AB:(N,2,H,W)")
    N, _, H, W = L.shape
    if AB.shape[0] != N or AB.shape[2:] != (H, W):
        raise ValueError("L / AB shape mismatch")

    dflt_cap, dflt_tc = _tpu_tuning()
    ts_cap = dflt_cap if ts_cap is None else ts_cap
    num_tc = dflt_tc if num_tc is None else num_tc

    L = L.astype(jnp.float32)
    AB = AB.astype(jnp.float32)

    HW = H * W
    if HW % _LANE == 0:
        # Lane-dense path: metadata-only re-view, no copies.
        rows, cols = HW // _LANE, _LANE
        l_in = L.reshape(N, 1, rows, cols)
        ab_in = AB.reshape(N, 2, rows, cols)

        def back(rgb4):
            return rgb4.reshape(N, 3, H, W)     # metadata-only
    else:
        # Ragged spatial size: run directly on NCHW (no pad, no post-slice).
        rows, cols = H, W
        l_in, ab_in = L, AB

        def back(rgb4):
            return rgb4

    # Row-tile selection (last block dim = cols = full dim or 128).
    elems_cap = ts_cap * _LANE
    if rows * cols <= elems_cap:
        ts = rows                                   # block dim == full array dim
    else:
        ts = max(8, (elems_cap // cols) // 8 * 8)   # multiple of 8
    num_t = pl.cdiv(rows, ts)
    if num_tc >= 2 and N * num_t == 1 and rows >= 16:
        # Dual-TensorCore parts: give both cores a tile even for one small image.
        ts = ((rows + 1) // 2 + 7) // 8 * 8
        num_t = pl.cdiv(rows, ts)

    step_bytes = 6 * ts * cols * 4                  # L + a + b + R + G + B per step
    vmem_limit = min(max(32 << 20, 2 * step_bytes + (16 << 20)), 48 << 20)

    grid = (N, num_t)
    in_specs = [
        pl.BlockSpec((1, 1, ts, cols), lambda n, t: (n, 0, t, 0)),   # L
        pl.BlockSpec((1, 2, ts, cols), lambda n, t: (n, 0, t, 0)),   # AB
    ]
    rgb_spec = pl.BlockSpec((1, 3, ts, cols), lambda n, t: (n, 0, t, 0))
    cparams = pltpu.CompilerParams(
        dimension_semantics=("parallel", "parallel"),
        vmem_limit_bytes=vmem_limit,
    )

    if not with_flag:
        rgb4 = pl.pallas_call(
            _rgb_kernel,
            out_shape=jax.ShapeDtypeStruct((N, 3, rows, cols), jnp.float32),
            grid_spec=pltpu.PrefetchScalarGridSpec(
                num_scalar_prefetch=0, grid=grid,
                in_specs=in_specs, out_specs=rgb_spec),
            compiler_params=cparams,
        )(l_in, ab_in)
        return back(rgb4), None

    kern = functools.partial(_rgb_flag_kernel, total_rows=rows, tile_rows=ts)
    rgb4, flags = pl.pallas_call(
        kern,
        out_shape=(
            jax.ShapeDtypeStruct((N, 3, rows, cols), jnp.float32),
            jax.ShapeDtypeStruct((N, num_t, 8, _LANE), jnp.float32),
        ),
        grid_spec=pltpu.PrefetchScalarGridSpec(
            num_scalar_prefetch=0, grid=grid,
            in_specs=in_specs,
            out_specs=(
                rgb_spec,
                pl.BlockSpec((1, 1, 8, _LANE), lambda n, t: (n, t, 0, 0)),
            )),
        compiler_params=cparams,
    )(l_in, ab_in)
    return back(rgb4), flags


def lab_to_rgb2(L, AB, *, ts_cap=None):
    """Jittable fast path: RGB only (no finite-check work at all)."""
    rgb, _ = _lab_to_rgb2_impl(L, AB, with_flag=False, ts_cap=ts_cap)
    return rgb


def lab_to_rgb2_with_flag(L, AB, *, ts_cap=None):
    """Jittable: returns (RGB, device-side bool 'output contains NaN').
    Check the flag whenever convenient (e.g. epoch boundary) instead of
    forcing a host sync per call."""
    rgb, flags = _lab_to_rgb2_impl(L, AB, with_flag=True, ts_cap=ts_cap)
    return rgb, jnp.any(flags > 0.0)


def lab_to_rgb2_checked(L, AB, *, ts_cap=None):
    """Torch-parity wrapper: raises on NaN/Inf in the RGB output.
    Does a blocking device->host sync — keep it out of tight loops."""
    rgb, bad = lab_to_rgb2_with_flag(L, AB, ts_cap=ts_cap)
    if bool(jax.device_get(bad)):
        raise ValueError("NaN or Inf detected in RGB output of LabToRGB.")
    return rgb


# ---------------------------------------------------------------------------
# Pure-JAX reference (mirrors the PyTorch forward) and self-test.
# ---------------------------------------------------------------------------
def _reference(L, AB):
    L_denorm = (L + 1.0) * 50.0
    AB_denorm = jnp.clip(AB * 127.0, -128.0, 127.0)
    a, b = AB_denorm[:, 0:1], AB_denorm[:, 1:2]
    Y = (L_denorm + 16.0) / 116.0
    X = Y + a / 500.0
    Z = Y - b / 200.0
    eps = 0.008856
    f = lambda t: jnp.where(t ** 3 > eps, t ** 3, (t - 16.0 / 116.0) / 7.787)
    X, Y, Z = f(X) * 95.047, f(Y) * 100.0, f(Z) * 108.883
    XYZ = jnp.concatenate([X, Y, Z], axis=1) / 100.0
    N, C, H, W = XYZ.shape
    RGB = jnp.matmul(MATRIX_XYZ_TO_RGB, XYZ.reshape(N, 3, -1)).reshape(N, 3, H, W)
    return jnp.clip(RGB, 0.0, 1.0)


if __name__ == "__main__":
    key = jax.random.PRNGKey(0)
    k1, k2, k3, k4 = jax.random.split(key, 4)

    # 1) Small lane-aligned case (H*W % 128 == 0), fast path under jit.
    N, H, W = 2, 16, 16
    L = jax.random.uniform(k1, (N, 1, H, W), jnp.float32, minval=-1.0, maxval=1.0)
    AB = jax.random.uniform(k2, (N, 2, H, W), jnp.float32, minval=-1.0, maxval=1.0)
    rgb = jax.jit(lab_to_rgb2)(L, AB)
    jax.block_until_ready(rgb)
    ref = _reference(L, AB)
    assert rgb.shape == (N, 3, H, W)
    assert jnp.allclose(rgb, ref, atol=1e-5, rtol=1e-5), float(
        jnp.max(jnp.abs(rgb - ref)))

    # 2) Ragged spatial size (H*W % 128 != 0): no-pad / no-slice NCHW path,
    #    through the checked (flag) variant.
    Lr = jax.random.uniform(k3, (1, 1, 13, 20), jnp.float32, minval=-1.0, maxval=1.0)
    ABr = jax.random.uniform(k4, (1, 2, 13, 20), jnp.float32, minval=-1.0, maxval=1.0)
    rgbr = lab_to_rgb2_checked(Lr, ABr)
    assert jnp.allclose(rgbr, _reference(Lr, ABr), atol=1e-5, rtol=1e-5)

    # 3) Forced ragged row-tiling (tiny tile cap): masked writeback of the
    #    partial last tile + flag masking of its garbage rows.
    Lt = jax.random.uniform(k1, (1, 1, 40, 32), jnp.float32, minval=-1.0, maxval=1.0)
    ABt = jax.random.uniform(k2, (1, 2, 40, 32), jnp.float32, minval=-1.0, maxval=1.0)
    rgbt = lab_to_rgb2_checked(Lt, ABt, ts_cap=8)
    assert jnp.allclose(rgbt, _reference(Lt, ABt), atol=1e-5, rtol=1e-5)

    # 4) NaN injection must raise in the checked variant (torch parity).
    AB_bad = AB.at[0, 0, 3, 5].set(jnp.nan)
    raised = False
    try:
        lab_to_rgb2_checked(L, AB_bad)
    except ValueError:
        raised = True
    assert raised, "NaN input did not trigger the checked-path error"

    print("KERNEL_OK")
</pallas_src>

<mosaic_0001>
module attributes {stable_mosaic.version = 11 : i64} {
  func.func @_rgb_kernel(%arg0: i32, %arg1: i32, %arg2: memref<1x1x2x128xf32, #tpu.memory_space<vmem>>, %arg3: memref<1x2x2x128xf32, #tpu.memory_space<vmem>>, %arg4: memref<1x3x2x128xf32, #tpu.memory_space<vmem>>) attributes {dimension_semantics = [#tpu.dimension_semantics<parallel>, #tpu.dimension_semantics<parallel>], iteration_bounds = array<i64: 2, 1>, scalar_prefetch = 0 : i64, scratch_operands = 0 : i64, tpu.core_type = #tpu.core_type<tc>, window_params = [{transform_indices = @transform_0, window_bounds = array<i64: 1, 1, 2, 128>}, {transform_indices = @transform_1, window_bounds = array<i64: 1, 2, 2, 128>}, {transform_indices = @transform_2, window_bounds = array<i64: 1, 3, 2, 128>}]} {
    %c0 = arith.constant 0 : index
    %c0_0 = arith.constant 0 : index
    %c0_1 = arith.constant 0 : index
    %c0_2 = arith.constant 0 : index
    %0 = vector.load %arg2[%c0, %c0_0, %c0_1, %c0_2] : memref<1x1x2x128xf32, #tpu.memory_space<vmem>>, vector<1x1x2x128xf32>
    %1 = vector.shape_cast %0 : vector<1x1x2x128xf32> to vector<2x128xf32>
    %c0_3 = arith.constant 0 : index
    %c0_4 = arith.constant 0 : index
    %c0_5 = arith.constant 0 : index
    %c0_6 = arith.constant 0 : index
    %2 = vector.load %arg3[%c0_3, %c0_4, %c0_5, %c0_6] : memref<1x2x2x128xf32, #tpu.memory_space<vmem>>, vector<1x1x2x128xf32>
    %3 = vector.shape_cast %2 : vector<1x1x2x128xf32> to vector<2x128xf32>
    %c0_7 = arith.constant 0 : index
    %c1 = arith.constant 1 : index
    %c0_8 = arith.constant 0 : index
    %c0_9 = arith.constant 0 : index
    %4 = vector.load %arg3[%c0_7, %c1, %c0_8, %c0_9] : memref<1x2x2x128xf32, #tpu.memory_space<vmem>>, vector<1x1x2x128xf32>
    %5 = vector.shape_cast %4 : vector<1x1x2x128xf32> to vector<2x128xf32>
    %cst = arith.constant 0.431034476 : f32
    %6 = vector.broadcast %cst : f32 to vector<2x128xf32>
    %7 = arith.mulf %1, %6 : vector<2x128xf32>
    %cst_10 = arith.constant 0.568965495 : f32
    %8 = vector.broadcast %cst_10 : f32 to vector<2x128xf32>
    %9 = arith.addf %7, %8 : vector<2x128xf32>
    %cst_11 = arith.constant 2.540000e-01 : f32
    %10 = vector.broadcast %cst_11 : f32 to vector<2x128xf32>
    %11 = arith.mulf %3, %10 : vector<2x128xf32>
    %cst_12 = arith.constant -2.560000e-01 : f32
    %cst_13 = arith.constant 2.540000e-01 : f32
    %12 = vector.broadcast %cst_12 : f32 to vector<2x128xf32>
    %13 = arith.maximumf %12, %11 : vector<2x128xf32>
    %14 = vector.broadcast %cst_13 : f32 to vector<2x128xf32>
    %15 = arith.minimumf %14, %13 : vector<2x128xf32>
    %cst_14 = arith.constant 6.350000e-01 : f32
    %16 = vector.broadcast %cst_14 : f32 to vector<2x128xf32>
    %17 = arith.mulf %5, %16 : vector<2x128xf32>
    %cst_15 = arith.constant -6.400000e-01 : f32
    %cst_16 = arith.constant 6.350000e-01 : f32
    %18 = vector.broadcast %cst_15 : f32 to vector<2x128xf32>
    %19 = arith.maximumf %18, %17 : vector<2x128xf32>
    %20 = vector.broadcast %cst_16 : f32 to vector<2x128xf32>
    %21 = arith.minimumf %20, %19 : vector<2x128xf32>
    %22 = arith.addf %9, %15 : vector<2x128xf32>
    %23 = arith.subf %9, %21 : vector<2x128xf32>
    %24 = arith.mulf %22, %22 : vector<2x128xf32>
    %25 = arith.mulf %24, %22 : vector<2x128xf32>
    %cst_17 = arith.constant 8.856000e-03 : f32
    %26 = vector.broadcast %cst_17 : f32 to vector<2x128xf32>
    %27 = arith.cmpf ogt, %25, %26 : vector<2x128xf32>
    %cst_18 = arith.constant 0.137931034 : f32
    %28 = vector.broadcast %cst_18 : f32 to vector<2x128xf32>
    %29 = arith.subf %22, %28 : vector<2x128xf32>
    %cst_19 = arith.constant 0.128419161 : f32
    %30 = vector.broadcast %cst_19 : f32 to vector<2x128xf32>
    %31 = arith.mulf %29, %30 : vector<2x128xf32>
    %32 = arith.select %27, %25, %31 : vector<2x128xi1>, vector<2x128xf32>
    %33 = arith.mulf %9, %9 : vector<2x128xf32>
    %34 = arith.mulf %33, %9 : vector<2x128xf32>
    %cst_20 = arith.constant 8.856000e-03 : f32
    %35 = vector.broadcast %cst_20 : f32 to vector<2x128xf32>
    %36 = arith.cmpf ogt, %34, %35 : vector<2x128xf32>
    %cst_21 = arith.constant 0.137931034 : f32
    %37 = vector.broadcast %cst_21 : f32 to vector<2x128xf32>
    %38 = arith.subf %9, %37 : vector<2x128xf32>
    %cst_22 = arith.constant 0.128419161 : f32
    %39 = vector.broadcast %cst_22 : f32 to vector<2x128xf32>
    %40 = arith.mulf %38, %39 : vector<2x128xf32>
    %41 = arith.select %36, %34, %40 : vector<2x128xi1>, vector<2x128xf32>
    %42 = arith.mulf %23, %23 : vector<2x128xf32>
    %43 = arith.mulf %42, %23 : vector<2x128xf32>
    %cst_23 = arith.constant 8.856000e-03 : f32
    %44 = vector.broadcast %cst_23 : f32 to vector<2x128xf32>
    %45 = arith.cmpf ogt, %43, %44 : vector<2x128xf32>
    %cst_24 = arith.constant 0.137931034 : f32
    %46 = vector.broadcast %cst_24 : f32 to vector<2x128xf32>
    %47 = arith.subf %23, %46 : vector<2x128xf32>
    %cst_25 = arith.constant 0.128419161 : f32
    %48 = vector.broadcast %cst_25 : f32 to vector<2x128xf32>
    %49 = arith.mulf %47, %48 : vector<2x128xf32>
    %50 = arith.select %45, %43, %49 : vector<2x128xi1>, vector<2x128xf32>
    %cst_26 = arith.constant 3.07995439 : f32
    %51 = vector.broadcast %cst_26 : f32 to vector<2x128xf32>
    %52 = arith.mulf %51, %32 : vector<2x128xf32>
    %cst_27 = arith.constant -1.53713846 : f32
    %53 = vector.broadcast %cst_27 : f32 to vector<2x128xf32>
    %54 = arith.mulf %53, %41 : vector<2x128xf32>
    %55 = arith.addf %52, %54 : vector<2x128xf32>
    %cst_28 = arith.constant -0.542815924 : f32
    %56 = vector.broadcast %cst_28 : f32 to vector<2x128xf32>
    %57 = arith.mulf %56, %50 : vector<2x128xf32>
    %58 = arith.addf %55, %57 : vector<2x128xf32>
    %cst_29 = arith.constant -0.92125827 : f32
    %59 = vector.broadcast %cst_29 : f32 to vector<2x128xf32>
    %60 = arith.mulf %59, %32 : vector<2x128xf32>
    %cst_30 = arith.constant 1.87601078 : f32
    %61 = vector.broadcast %cst_30 : f32 to vector<2x128xf32>
    %62 = arith.mulf %61, %41 : vector<2x128xf32>
    %63 = arith.addf %60, %62 : vector<2x128xf32>
    %cst_31 = arith.constant 0.0452474207 : f32
    %64 = vector.broadcast %cst_31 : f32 to vector<2x128xf32>
    %65 = arith.mulf %64, %50 : vector<2x128xf32>
    %66 = arith.addf %63, %65 : vector<2x128xf32>
    %cst_32 = arith.constant 0.0528873838 : f32
    %67 = vector.broadcast %cst_32 : f32 to vector<2x128xf32>
    %68 = arith.mulf %67, %32 : vector<2x128xf32>
    %cst_33 = arith.constant -0.204025894 : f32
    %69 = vector.broadcast %cst_33 : f32 to vector<2x128xf32>
    %70 = arith.mulf %69, %41 : vector<2x128xf32>
    %71 = arith.addf %68, %70 : vector<2x128xf32>
    %cst_34 = arith.constant 1.15113854 : f32
    %72 = vector.broadcast %cst_34 : f32 to vector<2x128xf32>
    %73 = arith.mulf %72, %50 : vector<2x128xf32>
    %74 = arith.addf %71, %73 : vector<2x128xf32>
    %cst_35 = arith.constant 0.000000e+00 : f32
    %cst_36 = arith.constant 1.000000e+00 : f32
    %75 = vector.broadcast %cst_35 : f32 to vector<2x128xf32>
    %76 = arith.maximumf %75, %58 : vector<2x128xf32>
    %77 = vector.broadcast %cst_36 : f32 to vector<2x128xf32>
    %78 = arith.minimumf %77, %76 : vector<2x128xf32>
    %cst_37 = arith.constant 0.000000e+00 : f32
    %cst_38 = arith.constant 1.000000e+00 : f32
    %79 = vector.broadcast %cst_37 : f32 to vector<2x128xf32>
    %80 = arith.maximumf %79, %66 : vector<2x128xf32>
    %81 = vector.broadcast %cst_38 : f32 to vector<2x128xf32>
    %82 = arith.minimumf %81, %80 : vector<2x128xf32>
    %cst_39 = arith.constant 0.000000e+00 : f32
    %cst_40 = arith.constant 1.000000e+00 : f32
    %83 = vector.broadcast %cst_39 : f32 to vector<2x128xf32>
    %84 = arith.maximumf %83, %74 : vector<2x128xf32>
    %85 = vector.broadcast %cst_40 : f32 to vector<2x128xf32>
    %86 = arith.minimumf %85, %84 : vector<2x128xf32>
    %c0_41 = arith.constant 0 : index
    %c0_42 = arith.constant 0 : index
    %c0_43 = arith.constant 0 : index
    %c0_44 = arith.constant 0 : index
    %87 = vector.load %arg4[%c0_41, %c0_42, %c0_43, %c0_44] : memref<1x3x2x128xf32, #tpu.memory_space<vmem>>, vector<1x1x2x128xf32>
    %88 = vector.shape_cast %87 : vector<1x1x2x128xf32> to vector<2x128xf32>
    %89 = vector.shape_cast %78 : vector<2x128xf32> to vector<1x1x2x128xf32>
    tpu.vector_store %arg4[%c0_41, %c0_42, %c0_43, %c0_44], %89 {strides = array<i32>} : memref<1x3x2x128xf32, #tpu.memory_space<vmem>>, vector<1x1x2x128xf32>,
    %c0_45 = arith.constant 0 : index
    %c1_46 = arith.constant 1 : index
    %c0_47 = arith.constant 0 : index
    %c0_48 = arith.constant 0 : index
    %90 = vector.load %arg4[%c0_45, %c1_46, %c0_47, %c0_48] : memref<1x3x2x128xf32, #tpu.memory_space<vmem>>, vector<1x1x2x128xf32>
    %91 = vector.shape_cast %90 : vector<1x1x2x128xf32> to vector<2x128xf32>
    %92 = vector.shape_cast %82 : vector<2x128xf32> to vector<1x1x2x128xf32>
    tpu.vector_store %arg4[%c0_45, %c1_46, %c0_47, %c0_48], %92 {strides = array<i32>} : memref<1x3x2x128xf32, #tpu.memory_space<vmem>>, vector<1x1x2x128xf32>,
    %c0_49 = arith.constant 0 : index
    %c2 = arith.constant 2 : index
    %c0_50 = arith.constant 0 : index
    %c0_51 = arith.constant 0 : index
    %93 = vector.load %arg4[%c0_49, %c2, %c0_50, %c0_51] : memref<1x3x2x128xf32, #tpu.memory_space<vmem>>, vector<1x1x2x128xf32>
    %94 = vector.shape_cast %93 : vector<1x1x2x128xf32> to vector<2x128xf32>
    %95 = vector.shape_cast %86 : vector<2x128xf32> to vector<1x1x2x128xf32>
    tpu.vector_store %arg4[%c0_49, %c2, %c0_50, %c0_51], %95 {strides = array<i32>} : memref<1x3x2x128xf32, #tpu.memory_space<vmem>>, vector<1x1x2x128xf32>,
    return
  }
  func.func @transform_0(%arg0: i32, %arg1: i32) -> (i32, i32, i32, i32) {
    %c0_i32 = arith.constant 0 : i32
    %c0_i32_0 = arith.constant 0 : i32
    %c0_i32_1 = arith.constant 0 : i32
    return %arg0, %c0_i32, %arg1, %c0_i32_0 : i32, i32, i32, i32
  }
  func.func @transform_1(%arg0: i32, %arg1: i32) -> (i32, i32, i32, i32) {
    %c0_i32 = arith.constant 0 : i32
    %c0_i32_0 = arith.constant 0 : i32
    %c0_i32_1 = arith.constant 0 : i32
    return %arg0, %c0_i32, %arg1, %c0_i32_0 : i32, i32, i32, i32
  }
  func.func @transform_2(%arg0: i32, %arg1: i32) -> (i32, i32, i32, i32) {
    %c0_i32 = arith.constant 0 : i32
    %c0_i32_0 = arith.constant 0 : i32
    %c0_i32_1 = arith.constant 0 : i32
    return %arg0, %c0_i32, %arg1, %c0_i32_0 : i32, i32, i32, i32
  }
}

</mosaic_0001>

<bundles_post_ra>
// kernel: lab_to_rgb2.1
= control target key start
LH: loop header
LB: loop body
LE: loop exit
PB: predicated region body
PF: predicated region fallthrough
CT: control target
= control target key end

     0   :  { %s441_s9 = smov 0   ;;  %s443_s10 = smov 0   ;;  %s482_s0 = inlined_call_operand.vmem [shape: f32[2,1,2,128], index: 0, kind: input, shape index: {}]   ;;  %s483_s1 = inlined_call_operand.vmem [shape: f32[2,2,2,128], index: 1, kind: input, shape index: {}]   ;;  %s484_s2 = inlined_call_operand.vmem [shape: f32[2,3,2,128], index: 2, kind: output, shape index: {}]  }
   0x1   :  { %s445_s11 = smov 0  }
   0x2 LB: > { %s24_s12 = sadd.s32 1, %s420_s10  ;;  %p363_p0 = scmp.ge.s32.totalorder %s424_s11, 1  ;;  %s424_s11 = sphi %s445_s11, %s12_s11   ;;  %s420_s10 = sphi %s443_s10, %s486_s10   ;;  %s416_s9 = sphi %s441_s9, %s485_s9  }
   0x3   : > { %p26_p1 = scmp.ge.s32.totalorder %s24_s12, 2  ;;  %p145_p2 = scmp.lt.s32.totalorder %s424_s11, 3 }
   0x5   : > { %s488_s12 = smov (%p26_p1, %s24_s12), 0  ;;  %p146_p3 = pnand %p363_p0, %p145_p2 }
   0x6   : > { %p180_p4 = scmp.lt.s32.totalorder (!%p146_p3), %s416_s9, 1 }
   0x7   : > { %149 = sbr.rel (%p146_p3) target bundleno = 45 (0x2d), region = 28 }
   0xe   : > { %s490_s9 = smov (!%p180_p4, %s416_s9), 1 }
   0xf   : > { %s364_s13 = sshll.u32 %s490_s9, 1  ;;  %s376_s14 = sshll.u32 %s490_s9, 2 }
  0x10   : > { %s186_s17 = scalar_lea.vmem %s482_s0, %s364_s13  ;;  %s194_s20 = scalar_lea.vmem %s483_s1, %s376_s14 }
  0x11   : > { %v203_v0 = vld [vmem:[%s186_s17] sm:$0x3]  ;;  %v368_v2 = vld [vmem:[%s194_s20 + $0x2] sm:$0x3]  ;;  %s377_s21 = smul.u32 6, %s490_s9 }
  0x12   : > { %v204_v1 = vld [vmem:[%s194_s20] sm:$0x3]  ;;  %v207_v3 = vmul.f32 0.43103448, %v203_v0  ;;  %v212_v5 = vmul.f32 0.635, %v368_v2 }
  0x13   : > { %v209_v4 = vmul.f32 0.254, %v204_v1  ;;  %s202_s24 = scalar_lea.vmem %s484_s2, %s377_s21 }
  0x14   : > { %v208_v6 = vadd.f32 0.5689655, %v207_v3  ;;  %v213_v8 = vmax.f32 %v212_v5, -0.64 }
  0x15   : > { %v210_v7 = vmax.f32 %v209_v4, -0.256 }
  0x16   : > { %v223_v10 = vmul.f32 %v208_v6, %v208_v6  ;;  %v370_v11 = vadd.f32 -0.13793103, %v208_v6  ;;  %v214_v12 = vmin.f32 %v213_v8, 0.635 }
  0x17   : > { %v211_v9 = vmin.f32 %v210_v7, 0.254 }
  0x18   : > { %v224_v14 = vmul.f32 %v223_v10, %v208_v6  ;;  %v227_v15 = vmul.f32 0.12841916, %v370_v11  ;;  %v216_v16 = vsub.f32 %v208_v6, %v214_v12 }
  0x19   : > { %v215_v13 = vadd.f32 %v211_v9, %v208_v6 }
  0x1a   : > { %vm225_vm0 = vcmp.gt.f32.partialorder %v224_v14, 0.008856  ;;  %v229_v20 = vmul.f32 %v216_v16, %v216_v16  ;;  %v371_v21 = vadd.f32 -0.13793103, %v216_v16 }
  0x1b   : > { %v217_v17 = vmul.f32 %v215_v13, %v215_v13  ;;  %v369_v18 = vadd.f32 -0.13793103, %v215_v13  ;;  %v228_v19 = vsel %vm225_vm0, %v224_v14, %v227_v15 }
  0x1c   : > { %v230_v24 = vmul.f32 %v229_v20, %v216_v16  ;;  %v233_v25 = vmul.f32 0.12841916, %v371_v21  ;;  %v236_v26 = vmul.f32 -1.5371385, %v228_v19  ;;  %v241_v27 = vmul.f32 1.8760108, %v228_v19 }
  0x1d   : > { %v218_v22 = vmul.f32 %v217_v17, %v215_v13  ;;  %v221_v23 = vmul.f32 0.12841916, %v369_v18  ;;  %v246_v28 = vmul.f32 -0.2040259, %v228_v19 }
  0x1e   : > { %vm231_vm2 = vcmp.gt.f32.partialorder %v230_v24, 0.008856 }
  0x1f   : > { %vm219_vm1 = vcmp.gt.f32.partialorder %v218_v22, 0.008856  ;;  %v234_v30 = vsel %vm231_vm2, %v230_v24, %v233_v25 }
  0x20   : > { %v222_v29 = vsel %vm219_vm1, %v218_v22, %v221_v23  ;;  %v238_v34 = vmul.f32 -0.5428159, %v234_v30  ;;  %v243_v35 = vmul.f32 0.04524742, %v234_v30  ;;  %v248_v36 = vmul.f32 1.1511385, %v234_v30 }
  0x21   : > { %v235_v31 = vmul.f32 3.0799544, %v222_v29  ;;  %v240_v32 = vmul.f32 -0.9212583, %v222_v29  ;;  %v245_v33 = vmul.f32 0.052887384, %v222_v29 }
  0x23   : > { %v237_v37 = vadd.f32 %v236_v26, %v235_v31  ;;  %v242_v38 = vadd.f32 %v241_v27, %v240_v32  ;;  %v247_v39 = vadd.f32 %v246_v28, %v245_v33 }
  0x25   : > { %v239_v40 = vadd.f32 %v238_v34, %v237_v37  ;;  %v244_v41 = vadd.f32 %v243_v35, %v242_v38  ;;  %v249_v42 = vadd.f32 %v248_v36, %v247_v39 }
  0x27   : > { %v250_v43 = vmax.f32 %v239_v40, 0.0  ;;  %v252_v44 = vmax.f32 %v244_v41, 0.0  ;;  %v254_v45 = vmax.f32 %v249_v42, 0.0 }
  0x29   : > { %v251_v46 = vmin.f32 %v250_v43, 1.0  ;;  %v253_v47 = vmin.f32 %v252_v44, 1.0  ;;  %v255_v48 = vmin.f32 %v254_v45, 1.0 }
  0x2b   : > { %256 = vst [vmem:[%s202_s24] sm:$0x3] %v251_v46  ;;  %372 = vst [vmem:[%s202_s24 + $0x2] sm:$0x3] %v253_v47 }
  0x2c   : > { %373 = vst [vmem:[%s202_s24 + $0x4] sm:$0x3] %v255_v48 }
  0x2d PF: > { %s12_s11 = sadd.s32 1, %s424_s11   ;;  %s485_s9 = smov %s420_s10 }
  0x2e   : > { %p9_p5 = scmp.ge.s32.totalorder %s12_s11, 4   ;;  %s486_s10 = smov %s488_s12 }
  0x30   :  { %11 = sbr.rel (!%p9_p5) target bundleno = 2 (0x2), region = 64 }

</bundles_post_ra>
